<compile_context>
chip_gen: v7x
topology: tpu7x:2x2x1
jax: 0.10.0
libtpu: 0.0.40
codegen_flags: <defaults>
</compile_context>

<pallas_src>
import functools

import jax
import jax.numpy as jnp
from jax.experimental import pallas as pl
from jax.experimental.pallas import tpu as pltpu

_NEG = -1e30  # finite "-inf" for padded softmax lanes (avoids 0 * -inf = NaN)


def _round_up(x, m):
    return ((x + m - 1) // m) * m


# ---------------------------------------------------------------------------
# Parameter packing: actor & critic weights into ONE f32 slab, BLOCK-DIAGONAL
# per layer so the fused kernel needs only two MXU matmuls.
#   Columns = 2H  (actor half | critic half)
#   W1  (Din, 2H) : [[wa1, 0], [0, wc1]]            Din = D_A + D_C
#   b1  (1,  2H)  : [ba1 | bc1]
#   W2  (2H, 2H)  : [[wa2 (zero-padded to H cols), 0], [0, wc2]]
#   b2  (1,  2H)  : [ba2 (padded action cols = -1e30) | bc2]
#   W3  (1,  2H)  : [wc3^T | 0]        (critic head applied on the VPU)
#   b3  (1,  2H)  : [bc3, 0, ...]
# Every segment is padded to a multiple of 8 rows so in-kernel ref slices stay
# sublane-aligned.  Build ONCE per parameter set (hoisted out of the hot path).
# ---------------------------------------------------------------------------
def pack_params(actor_params, critic_params):
    wa1, ba1, wa2, ba2 = actor_params
    wc1, bc1, wc2, bc2, wc3, bc3 = critic_params
    D_A, H = wa1.shape
    A = wa2.shape[1]
    D_C = wc1.shape[0]
    assert wc2.shape == (H, H) and wc3.shape == (H, 1) and A <= H
    Din = D_A + D_C
    C = 2 * H
    f32 = jnp.float32

    W1 = jnp.zeros((Din, C), f32)
    W1 = W1.at[:D_A, :H].set(wa1.astype(f32))
    W1 = W1.at[D_A:, H:].set(wc1.astype(f32))
    b1 = jnp.zeros((1, C), f32)
    b1 = b1.at[:, :H].set(ba1.reshape(1, H).astype(f32))
    b1 = b1.at[:, H:].set(bc1.reshape(1, H).astype(f32))

    W2 = jnp.zeros((C, C), f32)
    W2 = W2.at[:H, :A].set(wa2.astype(f32))
    W2 = W2.at[H:, H:].set(wc2.astype(f32))
    b2 = jnp.zeros((1, C), f32)
    b2 = b2.at[:, :H].set(_NEG)                    # padded action lanes
    b2 = b2.at[:, :A].set(ba2.reshape(1, A).astype(f32))
    b2 = b2.at[:, H:].set(bc2.reshape(1, H).astype(f32))

    W3 = jnp.zeros((1, C), f32)
    W3 = W3.at[:, :H].set(wc3.reshape(H, 1).T.astype(f32))
    b3 = jnp.zeros((1, C), f32)
    b3 = b3.at[0, 0].set(bc3.reshape(()).astype(f32))

    segs, offs = [], {}

    def add(name, arr):
        rows = _round_up(arr.shape[0], 8)
        buf = jnp.zeros((rows, C), f32).at[:arr.shape[0], :].set(arr)
        offs[name] = sum(int(s.shape[0]) for s in segs)
        segs.append(buf)

    add("W1", W1)
    add("b1", b1)
    add("W2", W2)
    add("b2", b2)
    add("W3", W3)
    add("b3", b3)

    slab = jnp.concatenate(segs, axis=0)
    dims = dict(D_A=D_A, D_C=D_C, H=H, A=A, Din=Din)
    return slab, offs, dims


# ---------------------------------------------------------------------------
# Fused act() + evaluate() kernel.  One input block (states + action fused),
# one output block (probs + packed scalars), weights sliced through the ref.
# ---------------------------------------------------------------------------
def _fused_kernel(x_ref, p_ref, out_ref, *, offs, Din, H, A):
    C = 2 * H
    # zero-cost ref views -> only the rows each matmul needs are loaded
    W1 = p_ref[offs["W1"]:offs["W1"] + Din, :]
    b1 = p_ref[offs["b1"]:offs["b1"] + 1, :]
    W2 = p_ref[offs["W2"]:offs["W2"] + C, :]
    b2 = p_ref[offs["b2"]:offs["b2"] + 1, :]
    w3 = p_ref[offs["W3"]:offs["W3"] + 1, 0:H]     # (1, H) == wc3^T
    b3 = p_ref[offs["b3"]:offs["b3"] + 1, 0:1]     # (1, 1)

    x = x_ref[...].astype(jnp.float32)             # storage may be bf16; math is f32
    Bt = x.shape[0]
    xin = x[:, :Din]                               # [logic | neural] rows
    act = x[:, Din:Din + 1].astype(jnp.int32)      # action index

    # fused layer 1 (actor + critic, block-diagonal), ReLU on both halves
    h = jnp.maximum(jnp.dot(xin, W1, preferred_element_type=jnp.float32) + b1, 0.0)
    # fused layer 2: actor logits (padded lanes biased to -1e30) | critic hidden
    y2 = jnp.dot(h, W2, preferred_element_type=jnp.float32) + b2
    logits = y2[:, :H]
    h2 = jnp.maximum(y2[:, H:], 0.0)

    # softmax over A predicates (lanes >= A underflow to exactly 0 in f32)
    m = jnp.max(logits, axis=-1, keepdims=True)
    lse = m + jnp.log(jnp.sum(jnp.exp(logits - m), axis=-1, keepdims=True))
    probs = jnp.exp(logits - lse)                  # (Bt, H)

    ids = jax.lax.broadcasted_iota(jnp.int32, (Bt, H), 1)

    # evaluate(): Categorical(probs).log_prob(action) and .entropy()
    sel = ids == act
    logp_eval = jnp.sum(jnp.where(sel, logits, 0.0), axis=-1, keepdims=True) - lse
    entropy = lse - jnp.sum(probs * logits, axis=-1, keepdims=True)

    # act() greedy branch: first lane achieving the max (== argmax of probs)
    hit = logits == m
    action_g = jnp.min(jnp.where(hit, ids, H), axis=-1, keepdims=True)
    logp_greedy = m - lse

    # critic head on the VPU: value = h2 . wc3 + bc3
    value = jnp.sum(h2 * w3, axis=-1, keepdims=True) + b3

    # pack the five per-row scalars into lanes H..H+4 of the single output block
    col = jax.lax.broadcasted_iota(jnp.int32, (Bt, 8), 1)
    scal = jnp.where(col == 0, logp_eval, 0.0)
    scal = jnp.where(col == 1, value, scal)
    scal = jnp.where(col == 2, entropy, scal)
    scal = jnp.where(col == 3, action_g.astype(jnp.float32), scal)
    scal = jnp.where(col == 4, logp_greedy, scal)

    out_ref[...] = jnp.concatenate([probs, scal], axis=-1)


# ---------------------------------------------------------------------------
# Wrapper: one pallas_call covering both act() and evaluate().
#   packed = pack_params(actor_params, critic_params)   # build ONCE, reuse
# ---------------------------------------------------------------------------
def nsfr_act_evaluate(neural_state, logic_state, action, packed, *,
                      tile_b=2048, io_dtype=jnp.float32):
    slab, offs, dims = packed
    D_A, D_C, H, A, Din = dims["D_A"], dims["D_C"], dims["H"], dims["A"], dims["Din"]

    B = logic_state.shape[0]
    ls = logic_state.reshape(B, -1).astype(jnp.float32)
    ns = neural_state.reshape(B, -1).astype(jnp.float32)
    assert ls.shape[1] == D_A and ns.shape[1] == D_C
    act_f = action.reshape(B, 1).astype(jnp.float32)   # small ints, exact in f32/bf16

    # fuse the three per-row inputs into ONE (B, Din+1) stream
    xin = jnp.concatenate([ls, ns, act_f], axis=-1).astype(io_dtype)

    # Batch tiling:
    #   tiny B (per-step act() latency path)  -> one small 8-aligned block
    #   mid B                                 -> split so nb >= 2 (both v7x TCs)
    #   large B (evaluate throughput path)    -> big tiles (default 2048)
    if B <= 512:
        tb = _round_up(max(B, 8), 8)
    else:
        tb = min(tile_b, _round_up((B + 1) // 2, 8))
    nb = pl.cdiv(B, tb)
    B_pad = nb * tb
    if B_pad != B:
        xin = jnp.pad(xin, ((0, B_pad - B), (0, 0)))

    R, C = slab.shape
    kernel = functools.partial(_fused_kernel, offs=offs, Din=Din, H=H, A=A)

    out = pl.pallas_call(
        kernel,
        grid=(nb,),
        in_specs=[
            pl.BlockSpec((tb, Din + 1), lambda i: (i, 0)),   # fused states+action
            pl.BlockSpec((R, C), lambda i: (0, 0)),          # weight slab, resident
        ],
        out_specs=pl.BlockSpec((tb, H + 8), lambda i: (i, 0)),
        out_shape=jax.ShapeDtypeStruct((B_pad, H + 8), jnp.float32),
        compiler_params=pltpu.CompilerParams(
            dimension_semantics=("parallel",),
            vmem_limit_bytes=32 * 1024 * 1024),
    )(xin, slab)

    probs = out[:B, :A]
    logp_eval = out[:B, H + 0]
    value = out[:B, H + 1:H + 2]
    entropy = out[:B, H + 2]
    greedy_action = out[:B, H + 3].astype(jnp.int32)
    logp_greedy = out[:B, H + 4]
    return logp_eval, value, entropy, probs, greedy_action, logp_greedy


# ---------------------------------------------------------------------------
# Deterministic parameter init (PyTorch-Linear-style uniform) + JAX reference
# ---------------------------------------------------------------------------
def _linear(key, fan_in, fan_out):
    kw, kb = jax.random.split(key)
    s = 1.0 / jnp.sqrt(fan_in)
    w = jax.random.uniform(kw, (fan_in, fan_out), jnp.float32, -s, s)
    b = jax.random.uniform(kb, (1, fan_out), jnp.float32, -s, s)
    return w, b


def _reference(ls, ns, act, ap, cp):
    """Pure-JAX reference mirroring act()/evaluate() semantics."""
    wa1, ba1, wa2, ba2 = ap
    wc1, bc1, wc2, bc2, wc3, bc3 = cp
    B = ls.shape[0]
    x = ls.reshape(B, -1)
    h = jnp.maximum(x @ wa1 + ba1, 0.0)
    logits = h @ wa2 + ba2
    probs = jax.nn.softmax(logits, axis=-1)
    lp = jnp.log(probs)
    logp = jnp.take_along_axis(lp, act.reshape(B, 1), axis=-1)[:, 0]
    ent = -jnp.sum(probs * lp, axis=-1)
    n = ns.reshape(B, -1)
    h1 = jnp.maximum(n @ wc1 + bc1, 0.0)
    h2 = jnp.maximum(h1 @ wc2 + bc2, 0.0)
    val = h2 @ wc3 + bc3
    greedy = jnp.argmax(probs, axis=-1)
    greedy_lp = jnp.take_along_axis(lp, greedy[:, None], axis=-1)[:, 0]
    return logp, val, ent, probs, greedy, greedy_lp


def _check(out, ref):
    logp, values, entropy, probs, greedy_action, logp_greedy = out
    r_logp, r_val, r_ent, r_probs, r_greedy, r_glogp = ref
    assert jnp.allclose(logp, r_logp, atol=1e-5), "eval logprob mismatch"
    assert jnp.allclose(values, r_val, atol=1e-5), "value mismatch"
    assert jnp.allclose(entropy, r_ent, atol=1e-5), "entropy mismatch"
    assert jnp.allclose(probs, r_probs, atol=1e-5), "probs mismatch"
    assert jnp.array_equal(greedy_action, r_greedy), "argmax mismatch"
    assert jnp.allclose(logp_greedy, r_glogp, atol=1e-5), "greedy logprob mismatch"


if __name__ == "__main__":
    # Small getout-like shapes: 4 logic objects x 6 features, 6 action predicates.
    B, O, F = 2, 4, 6          # logic_state:  (B, 4, 6)
    NO, NF = 4, 6              # neural_state: (B, 4, 6)
    H, A = 32, 6               # hidden width, num_actions (len(prednames))

    key = jax.random.PRNGKey(0)
    k_ls, k_ns, k_a1, k_a2, k_c1, k_c2, k_c3, k_act = jax.random.split(key, 8)

    logic_state = jax.random.normal(k_ls, (B, O, F), jnp.float32)
    neural_state = jax.random.normal(k_ns, (B, NO, NF), jnp.float32)
    action = jax.random.randint(k_act, (B,), 0, A, jnp.int32)

    # actor params (logic-state MLP -> action probs over prednames)
    wa1, ba1 = _linear(k_a1, O * F, H)
    wa2, ba2 = _linear(k_a2, H, A)
    actor_params = (wa1, ba1, wa2, ba2)

    # critic params (neural-state MLP -> scalar value, out_size=1)
    wc1, bc1 = _linear(k_c1, NO * NF, H)
    wc2, bc2 = _linear(k_c2, H, H)
    wc3, bc3 = _linear(k_c3, H, 1)
    critic_params = (wc1, bc1, wc2, bc2, wc3, bc3)

    # hoist parameter packing out of the hot path (build once, reuse)
    packed = pack_params(actor_params, critic_params)

    # --- tiny-batch act() latency path ---
    out_small = nsfr_act_evaluate(neural_state, logic_state, action, packed)
    jax.block_until_ready(out_small)
    _check(out_small, _reference(logic_state, neural_state, action,
                                 actor_params, critic_params))

    # --- mid/large-batch evaluate() throughput path (exercises nb>=2 + padding) ---
    B2 = 600
    k2_ls, k2_ns, k2_act = jax.random.split(jax.random.PRNGKey(1), 3)
    ls2 = jax.random.normal(k2_ls, (B2, O, F), jnp.float32)
    ns2 = jax.random.normal(k2_ns, (B2, NO, NF), jnp.float32)
    act2 = jax.random.randint(k2_act, (B2,), 0, A, jnp.int32)
    out_big = nsfr_act_evaluate(ns2, ls2, act2, packed)
    jax.block_until_ready(out_big)
    _check(out_big, _reference(ls2, ns2, act2, actor_params, critic_params))

    print("KERNEL_OK")
</pallas_src>

<mosaic_0001>
module attributes {stable_mosaic.version = 11 : i64} {
  func.func @_fused_kernel(%arg0: i32, %arg1: memref<8x49xf32, #tpu.memory_space<vmem>>, %arg2: memref<144x64xf32, #tpu.memory_space<vmem>>, %arg3: memref<8x40xf32, #tpu.memory_space<vmem>>) attributes {dimension_semantics = [#tpu.dimension_semantics<parallel>], iteration_bounds = array<i64: 1>, scalar_prefetch = 0 : i64, scratch_operands = 0 : i64, tpu.core_type = #tpu.core_type<tc>, window_params = [{transform_indices = @transform_0, window_bounds = array<i64: 8, 49>}, {pipeline_mode = #tpu.pipeline_mode<synchronous>, transform_indices = @transform_1, window_bounds = array<i64: 144, 64>}, {transform_indices = @transform_2, window_bounds = array<i64: 8, 40>}]} {
    %c0 = arith.constant 0 : index
    %c0_0 = arith.constant 0 : index
    %0 = vector.load %arg2[%c0, %c0_0] : memref<144x64xf32, #tpu.memory_space<vmem>>, vector<48x64xf32>
    %c48 = arith.constant 48 : index
    %c0_1 = arith.constant 0 : index
    %1 = vector.load %arg2[%c48, %c0_1] : memref<144x64xf32, #tpu.memory_space<vmem>>, vector<1x64xf32>
    %c56 = arith.constant 56 : index
    %c0_2 = arith.constant 0 : index
    %2 = vector.load %arg2[%c56, %c0_2] : memref<144x64xf32, #tpu.memory_space<vmem>>, vector<64x64xf32>
    %c120 = arith.constant 120 : index
    %c0_3 = arith.constant 0 : index
    %3 = vector.load %arg2[%c120, %c0_3] : memref<144x64xf32, #tpu.memory_space<vmem>>, vector<1x64xf32>
    %c128 = arith.constant 128 : index
    %c0_4 = arith.constant 0 : index
    %4 = vector.load %arg2[%c128, %c0_4] : memref<144x64xf32, #tpu.memory_space<vmem>>, vector<1x32xf32>
    %c136 = arith.constant 136 : index
    %c0_5 = arith.constant 0 : index
    %5 = vector.load %arg2[%c136, %c0_5] : memref<144x64xf32, #tpu.memory_space<vmem>>, vector<1x1xf32>
    %c0_6 = arith.constant 0 : index
    %c0_7 = arith.constant 0 : index
    %6 = vector.load %arg1[%c0_6, %c0_7] : memref<8x49xf32, #tpu.memory_space<vmem>>, vector<8x49xf32>
    %7 = vector.extract_strided_slice %6 {offsets = [0, 0], sizes = [8, 48], strides = [1, 1]} : vector<8x49xf32> to vector<8x48xf32>
    %8 = vector.extract_strided_slice %6 {offsets = [0, 48], sizes = [8, 1], strides = [1, 1]} : vector<8x49xf32> to vector<8x1xf32>
    %9 = arith.fptosi %8 : vector<8x1xf32> to vector<8x1xi32>
    %cst = arith.constant dense<0.000000e+00> : vector<8x64xf32>
    %10 = tpu.matmul %7, %0, %cst {dimension_numbers = #tpu.dot_dimension_numbers<[1], [0], [0], [1], [0, 0, 1, 1], [], []>} : vector<8x48xf32>, vector<48x64xf32>, vector<8x64xf32> -> vector<8x64xf32>
    %11 = vector.broadcast %1 : vector<1x64xf32> to vector<8x64xf32>
    %12 = arith.addf %10, %11 : vector<8x64xf32>
    %cst_8 = arith.constant 0.000000e+00 : f32
    %13 = vector.broadcast %cst_8 : f32 to vector<8x64xf32>
    %14 = arith.maximumf %12, %13 : vector<8x64xf32>
    %cst_9 = arith.constant dense<0.000000e+00> : vector<8x64xf32>
    %15 = tpu.matmul %14, %2, %cst_9 {dimension_numbers = #tpu.dot_dimension_numbers<[1], [0], [0], [1], [0, 0, 1, 1], [], []>} : vector<8x64xf32>, vector<64x64xf32>, vector<8x64xf32> -> vector<8x64xf32>
    %16 = vector.broadcast %3 : vector<1x64xf32> to vector<8x64xf32>
    %17 = arith.addf %15, %16 : vector<8x64xf32>
    %18 = vector.extract_strided_slice %17 {offsets = [0, 0], sizes = [8, 32], strides = [1, 1]} : vector<8x64xf32> to vector<8x32xf32>
    %19 = vector.extract_strided_slice %17 {offsets = [0, 32], sizes = [8, 32], strides = [1, 1]} : vector<8x64xf32> to vector<8x32xf32>
    %cst_10 = arith.constant 0.000000e+00 : f32
    %20 = vector.broadcast %cst_10 : f32 to vector<8x32xf32>
    %21 = arith.maximumf %19, %20 : vector<8x32xf32>
    %cst_11 = arith.constant dense<0xFF800000> : vector<8xf32>
    %22 = vector.multi_reduction <maximumf>, %18, %cst_11 [1] : vector<8x32xf32> to vector<8xf32>
    %23 = vector.shape_cast %22 : vector<8xf32> to vector<8x1xf32>
    %24 = vector.broadcast %23 : vector<8x1xf32> to vector<8x32xf32>
    %25 = arith.subf %18, %24 : vector<8x32xf32>
    %26 = math.exp %25 : vector<8x32xf32>
    %cst_12 = arith.constant dense<0.000000e+00> : vector<8xf32>
    %27 = vector.multi_reduction <add>, %26, %cst_12 [1] : vector<8x32xf32> to vector<8xf32>
    %28 = vector.shape_cast %27 : vector<8xf32> to vector<8x1xf32>
    %29 = math.log %28 : vector<8x1xf32>
    %30 = arith.addf %23, %29 : vector<8x1xf32>
    %31 = vector.broadcast %30 : vector<8x1xf32> to vector<8x32xf32>
    %32 = arith.subf %18, %31 : vector<8x32xf32>
    %33 = math.exp %32 : vector<8x32xf32>
    %34 = tpu.iota {dimensions = array<i32: 1>} : vector<8x32xi32>
    %35 = vector.broadcast %9 : vector<8x1xi32> to vector<8x32xi32>
    %36 = arith.cmpi eq, %34, %35 : vector<8x32xi32>
    %cst_13 = arith.constant 0.000000e+00 : f32
    %37 = vector.broadcast %cst_13 : f32 to vector<8x32xf32>
    %38 = arith.select %36, %18, %37 : vector<8x32xi1>, vector<8x32xf32>
    %cst_14 = arith.constant dense<0.000000e+00> : vector<8xf32>
    %39 = vector.multi_reduction <add>, %38, %cst_14 [1] : vector<8x32xf32> to vector<8xf32>
    %40 = vector.shape_cast %39 : vector<8xf32> to vector<8x1xf32>
    %41 = arith.subf %40, %30 : vector<8x1xf32>
    %42 = arith.mulf %33, %18 : vector<8x32xf32>
    %cst_15 = arith.constant dense<0.000000e+00> : vector<8xf32>
    %43 = vector.multi_reduction <add>, %42, %cst_15 [1] : vector<8x32xf32> to vector<8xf32>
    %44 = vector.shape_cast %43 : vector<8xf32> to vector<8x1xf32>
    %45 = arith.subf %30, %44 : vector<8x1xf32>
    %46 = vector.broadcast %23 : vector<8x1xf32> to vector<8x32xf32>
    %47 = arith.cmpf oeq, %18, %46 : vector<8x32xf32>
    %c32_i32 = arith.constant 32 : i32
    %48 = vector.broadcast %c32_i32 : i32 to vector<8x32xi32>
    %49 = arith.select %47, %34, %48 : vector<8x32xi1>, vector<8x32xi32>
    %cst_16 = arith.constant dense<2147483647> : vector<8xi32>
    %50 = vector.multi_reduction <minsi>, %49, %cst_16 [1] : vector<8x32xi32> to vector<8xi32>
    %51 = vector.shape_cast %50 : vector<8xi32> to vector<8x1xi32>
    %52 = arith.subf %23, %30 : vector<8x1xf32>
    %53 = vector.broadcast %4 : vector<1x32xf32> to vector<8x32xf32>
    %54 = arith.mulf %21, %53 : vector<8x32xf32>
    %cst_17 = arith.constant dense<0.000000e+00> : vector<8xf32>
    %55 = vector.multi_reduction <add>, %54, %cst_17 [1] : vector<8x32xf32> to vector<8xf32>
    %56 = vector.shape_cast %55 : vector<8xf32> to vector<8x1xf32>
    %57 = vector.broadcast %5 : vector<1x1xf32> to vector<8x1xf32>
    %58 = arith.addf %56, %57 : vector<8x1xf32>
    %59 = tpu.iota {dimensions = array<i32: 1>} : vector<8x8xi32>
    %c0_i32 = arith.constant 0 : i32
    %60 = vector.broadcast %c0_i32 : i32 to vector<8x8xi32>
    %61 = arith.cmpi eq, %59, %60 : vector<8x8xi32>
    %cst_18 = arith.constant 0.000000e+00 : f32
    %62 = vector.shape_cast %41 : vector<8x1xf32> to vector<8x1xf32>
    %63 = vector.broadcast %62 : vector<8x1xf32> to vector<8x8xf32>
    %64 = vector.broadcast %cst_18 : f32 to vector<8x8xf32>
    %65 = arith.select %61, %63, %64 : vector<8x8xi1>, vector<8x8xf32>
    %c1_i32 = arith.constant 1 : i32
    %66 = vector.broadcast %c1_i32 : i32 to vector<8x8xi32>
    %67 = arith.cmpi eq, %59, %66 : vector<8x8xi32>
    %68 = vector.shape_cast %58 : vector<8x1xf32> to vector<8x1xf32>
    %69 = vector.broadcast %68 : vector<8x1xf32> to vector<8x8xf32>
    %70 = arith.select %67, %69, %65 : vector<8x8xi1>, vector<8x8xf32>
    %c2_i32 = arith.constant 2 : i32
    %71 = vector.broadcast %c2_i32 : i32 to vector<8x8xi32>
    %72 = arith.cmpi eq, %59, %71 : vector<8x8xi32>
    %73 = vector.shape_cast %45 : vector<8x1xf32> to vector<8x1xf32>
    %74 = vector.broadcast %73 : vector<8x1xf32> to vector<8x8xf32>
    %75 = arith.select %72, %74, %70 : vector<8x8xi1>, vector<8x8xf32>
    %c3_i32 = arith.constant 3 : i32
    %76 = vector.broadcast %c3_i32 : i32 to vector<8x8xi32>
    %77 = arith.cmpi eq, %59, %76 : vector<8x8xi32>
    %78 = arith.sitofp %51 : vector<8x1xi32> to vector<8x1xf32>
    %79 = vector.shape_cast %78 : vector<8x1xf32> to vector<8x1xf32>
    %80 = vector.broadcast %79 : vector<8x1xf32> to vector<8x8xf32>
    %81 = arith.select %77, %80, %75 : vector<8x8xi1>, vector<8x8xf32>
    %c4_i32 = arith.constant 4 : i32
    %82 = vector.broadcast %c4_i32 : i32 to vector<8x8xi32>
    %83 = arith.cmpi eq, %59, %82 : vector<8x8xi32>
    %84 = vector.shape_cast %52 : vector<8x1xf32> to vector<8x1xf32>
    %85 = vector.broadcast %84 : vector<8x1xf32> to vector<8x8xf32>
    %86 = arith.select %83, %85, %81 : vector<8x8xi1>, vector<8x8xf32>
    %87 = tpu.concatenate %33, %86 in 1 : vector<8x32xf32>, vector<8x8xf32> -> vector<8x40xf32>
    %c0_19 = arith.constant 0 : index
    %c0_20 = arith.constant 0 : index
    %88 = vector.load %arg3[%c0_19, %c0_20] : memref<8x40xf32, #tpu.memory_space<vmem>>, vector<8x40xf32>
    tpu.vector_store %arg3[%c0_19, %c0_20], %87 {strides = array<i32>} : memref<8x40xf32, #tpu.memory_space<vmem>>, vector<8x40xf32>,
    return
  }
  func.func @transform_0(%arg0: i32) -> (i32, i32) {
    %c0_i32 = arith.constant 0 : i32
    %c0_i32_0 = arith.constant 0 : i32
    return %arg0, %c0_i32 : i32, i32
  }
  func.func @transform_1(%arg0: i32) -> (i32, i32) {
    %c0_i32 = arith.constant 0 : i32
    %c0_i32_0 = arith.constant 0 : i32
    %c0_i32_1 = arith.constant 0 : i32
    return %c0_i32, %c0_i32_0 : i32, i32
  }
  func.func @transform_2(%arg0: i32) -> (i32, i32) {
    %c0_i32 = arith.constant 0 : i32
    %c0_i32_0 = arith.constant 0 : i32
    return %arg0, %c0_i32 : i32, i32
  }
}

</mosaic_0001>

<bundles_post_ra>
// kernel: tpu_custom_call.1
= control target key start
LH: loop header
LB: loop body
LE: loop exit
PB: predicated region body
PF: predicated region fallthrough
CT: control target
= control target key end

     0   :  { %v417_v3 = vmov 0.0|0.0   ;;  %vm418_vm0 = vmmov 0   ;;  %v419_v6 = vmov 0.0   ;;  %s533_s0 = inlined_call_operand.vmem [shape: f32[8,49], index: 0, kind: input, shape index: {}]   ;;  %s534_s1 = inlined_call_operand.vmem [shape: f32[144,64], index: 1, kind: input, shape index: {}]   ;;  %s535_s2 = inlined_call_operand.hbm [shape: f32[8,40], index: 2, kind: output, shape index: {}]  }
   0x1   :  { %v12_v0 = vld [vmem:[%s534_s1] sm:$0xff]  ;;  %v13_v1 = vld [vmem:[%s534_s1 + $0x8] sm:$0xff]  ;;  %v14_v2 = vld [vmem:[%s534_s1 + $0x10] sm:$0xff]  ;;  %354 = vmatprep.subr.bf16.mxu0 %v417_v3  ;;  %332 = vmatprep.mubr.msk.f32.mxu0 %vm418_vm0, %v419_v6 }
   0x2   :  { %v355_v4 = vpack.c.bf16 %v13_v1, %v12_v0  ;;  %v15_v5 = vld [vmem:[%s534_s1 + $0x18] sm:$0xff]  ;;  %363 = vmatprep.subr.bf16.mxu1 %v417_v3  ;;  %v20_v8 = vld [vmem:[%s534_s1 + $0x40] sm:$0xff]  ;;  %351 = vmatprep.mubr.msk.f32.mxu1 %vm418_vm0, %v419_v6  ;;  %v21_v11 = vld [vmem:[%s534_s1 + $0x48] sm:$0xff] }
   0x3   :  { %v19_v7 = vld [vmem:[%s534_s1 + $0x38] sm:$0xff]  ;;  %v358_v9 = vpack.c.bf16 %v15_v5, %v14_v2  ;;  %v22_v12 = vld [vmem:[%s534_s1 + $0x50] sm:$0xff]  ;;  %v16_v13 = vld [vmem:[%s534_s1 + $0x20] sm:$0xff] }
   0x4   :  { %356 = vmatpush3.bf16.msra.mxu0 %v355_v4  ;;  %v364_v10 = vpack.c.bf16 %v20_v8, %v19_v7  ;;  %v17_v14 = vld [vmem:[%s534_s1 + $0x28] sm:$0xff] }
   0x5   :  { %357 = vmatprep.subr.bf16.mxu0 %v417_v3 }
   0x6   :  { %7 = vsyncpa [#allocation3], 0  ;;  %365 = vmatpush3.bf16.msra.mxu1 %v364_v10  ;;  %v367_v15 = vpack.c.bf16 %v22_v12, %v21_v11  ;;  %v23_v16 = vld [vmem:[%s534_s1 + $0x58] sm:$0xff]  ;;  %v24_v17 = vld [vmem:[%s534_s1 + $0x60] sm:$0xff]  ;;  %v361_v18 = vpack.c.bf16 %v17_v14, %v16_v13  ;;  %vm36_vm1 = vcmask 392192   ;;  %vm115_vm2 = vcmask 523264  }
   0x7   :  { %366 = vmatprep.subr.bf16.mxu1 %v417_v3  ;;  %v370_v19 = vpack.c.bf16 %v24_v17, %v23_v16  ;;  %v30_v20 = vld [vmem:[%s533_s0] sm:$0xff]  ;;  %v25_v21 = vld [vmem:[%s534_s1 + $0x68] sm:$0xff]  ;;  %v26_v22 = vld [vmem:[%s534_s1 + $0x70] sm:$0xff]  ;;  %vm190_vm3 = vcmask 261120   ;;  %s420_s16 = smov 32   ;;  %v421_v35 = vmov 48   ;;  %v206_v36 = vlaneseq }
   0x8   :  { %359 = vmatpush3.bf16.msra.mxu0 %v358_v9  ;;  %v373_v23 = vpack.c.bf16 %v26_v22, %v25_v21  ;;  %v298_v24 = vld [vmem:[%s534_s1 + $0x30] ss:$0 sm:$0xff]  ;;  %v300_v29 = vld [vmem:[%s534_s1 + $0x78] ss:$0 sm:$0xff]  ;;  %v302_v34 = vld [vmem:[%s534_s1 + $0x80] ss:$0 sm:$0xff]  ;;  %385 = vset.pattern.permute.xlu1 %v421_v35  ;;  %v375_v50 = vtrunc.f32 %v30_v20 }
   0x9   :  { %360 = vmatprep.subr.bf16.mxu0 %v417_v3  ;;  %v496_v37 = vand.u32 127, %v206_v36  ;;  %s422_s17 = smov 96   ;;  %v423_v54 = vmov 0   ;;  %v303_v7 = vld [vmem:[%s534_s1 + $0x88] ss:$0 sm:$0xff]  ;;  %s424_s1 = smov [#allocation2]  }
   0xa   :  { %368 = vmatpush3.bf16.msra.mxu1 %v367_v15  ;;  %v376_v51 = vcvt.f32.s32 %v375_v50  ;;  %386 = vset.pattern.permute.xlu0 %v423_v54  ;;  %s290_s20 = sshll.u32 %s424_s1, 4  ;;  %vm282_vm12 = vcmask 326656   ;;  %s291_s20 = int_to_ptr.vmem [resolvable:$true] %s290_s20 }
   0xb   :  { %369 = vmatprep.subr.bf16.mxu1 %v417_v3  ;;  %vm261_vm7 = vcmp.eq.s32.totalorder %v496_v37, 0  ;;  %vm263_vm8 = vcmp.eq.s32.totalorder %v496_v37, 1  ;;  %vm270_vm9 = vcmp.eq.s32.totalorder %v496_v37, 2  ;;  %vm272_vm10 = vcmp.eq.s32.totalorder %v496_v37, 3  ;;  %s393_s21 = scalar_lea.vmem %s291_s20, 128  ;;  %p398_p1 = scmp.lt.s32.totalorder %s291_s20, %s291_s20 }
   0xc   :  { %362 = vmatpush3.bf16.msra.mxu0 %v361_v18  ;;  %vm275_vm11 = vcmp.eq.s32.totalorder %v496_v37, 4  ;;  %p394_p0 = scmp.ne.s32.totalorder %s291_s20, %s393_s21  ;;  %p399_p2 = scmp.lt.s32.totalorder %s393_s21, %s393_s21 }
   0xe   :  { %371 = vmatpush3.bf16.msra.mxu1 %v370_v19  ;;  %p400_p3 = por %p399_p2, %p398_p1 }
   0xf   :  { %333 = vmatmul.mubr.msk.f32.vlgmr.msra.gmra.mrb[0].mxu0 %vm36_vm1, %v30_v20  ;;  %372 = vmatprep.subr.bf16.mxu1 %v417_v3 }
  0x10   :  { %p401_p4 = pnand %p400_p3, %p394_p0 }
  0x12   :  { %374 = vmatpush3.bf16.msra.mxu1 %v373_v23 }
  0xe2   :  { %v106_v25 = vpop.f32.mrb[0].mxu0 }
  0xe3   :  { %v107_v26 = vadd.f32 %v298_v24, %v106_v25  ;;  %v334_v27 = vpop.f32.mrb[1].mxu0 }
  0xe5   :  { %v110_v28 = vmax.f32 %v107_v26, 0.0 }
  0xe7   :  { %352 = vmatmul.mubr.msk.f32.vlgmr.msra.gmra.mrb[0].mxu1 %vm115_vm2, %v110_v28 }
 0x1ba   :  { %v185_v30 = vpop.f32.mrb[0].mxu1 }
 0x1bb   :  { %v186_v31 = vadd.f32 %v300_v29, %v185_v30  ;;  %v353_v32 = vpop.f32.mrb[1].mxu1 }
 0x1bd   :  { %v191_v33 = vsel %vm190_vm3, %v186_v31, -inf  ;;  %v189_v40 = vmax.f32 %v186_v31, 0.0 }
 0x1be   :  { %192 = vmax.xlane.f32.xlu0 %v191_v33 }
 0x1d4   :  { %245 = vrot.lane.b32.xlu0 %v302_v34, %s420_s16 }
 0x24b   :  { %v498_v38 = vpop.xlane.xlu0 %192 }
 0x24c   :  { %vm222_vm4 = vcmp.eq.f32.partialorder %v186_v31, %v498_v38  ;;  %v194_v46 = vsub.f32 %v186_v31, %v498_v38 }
 0x24d   :  { %v223_v39 = vsel %vm222_vm4, %v496_v37, 32 }
 0x24e   :  { %v224_v41 = vsel %vm190_vm3, %v223_v39, 2147483647  ;;  %v195_v47 = vmul.f32 1.442695, %v194_v46 }
 0x24f   :  { %v246_v42 = vpop.permute.xlu0 %245  ;;  %v226_v43 = vshra.s32 %v224_v41, 16  ;;  %v225_v55 = vand.u32 65535, %v224_v41 }
 0x250   :  { %v248_v44 = vmul.f32 %v246_v42, %v189_v40  ;;  %387 = vpow2.f32 %v195_v47 }
 0x251   :  { %v228_v45 = vcvt.s32.f32 %v226_v43  ;;  %v227_v57 = vcvt.s32.f32 %v225_v55 }
 0x252   :  { %250 = vrot.lane.b32.xlu1 %v248_v44, %s422_s17 }
 0x253   :  { %229 = vmin.xlane.f32.xlu0 %v228_v45 }
 0x25a   :  { %v388_v48 = vpop.eup %387 }
 0x25b   :  { %v197_v49 = vsel %vm190_vm3, %v388_v48, 0.0 }
 0x276   :  { %198 = vadd.xlane.f32.xlu1 %v197_v49 }
 0x287   :  { %209 = vperm.xlu1 %385, %v376_v51  }
 0x2c4   :  { %v251_v52 = vpop.permute.xlu1 %250 }
 0x2c5   :  { %v253_v53 = vsel %vm190_vm3, %v251_v52, 0.0 }
 0x2c6   :  { %254 = vadd.xlane.f32.xlu0 %v253_v53 }
 0x2e0   :  { %v230_v56 = vpop.xlane.xlu0 %229 }
 0x2e1   :  { %vm231_vm5 = vcmp.eq.f32.partialorder %v228_v45, %v230_v56  ;;  %v236_v11 = vcvt.f32.s32 %v230_v56 }
 0x2e2   :  { %v232_v58 = vsel %vm231_vm5, %v227_v57, inf }
 0x2e3   :  { %233 = vmin.xlane.f32.xlu1 %v232_v58  ;;  %v237_v14 = vshll.u32 %v236_v11, 16 }
 0x303   :  { %v199_v59 = vpop.xlane.xlu1 %198 }
 0x304   :  { %389 = vlog2.f32 %v199_v59 }
 0x307   :  { %v210_v60 = vpop.permute.xlu1 %209 }
 0x308   :  { %vm211_vm6 = vcmp.eq.s32.totalorder %v496_v37, %v210_v60 }
 0x309   :  { %v212_v61 = vsel %vm211_vm6, %v186_v31, 0.0 }
 0x30a   :  { %v213_v62 = vsel %vm190_vm3, %v212_v61, 0.0 }
 0x30b   :  { %214 = vadd.xlane.f32.xlu0 %v213_v62 }
 0x30e   :  { %v390_v63 = vpop.eup %389 }
 0x30f   :  { %v201_v0 = vmul.f32 0.6931472, %v390_v63 }
 0x311   :  { %v202_v1 = vadd.f32 %v201_v0, %v498_v38 }
 0x313   :  { %v203_v2 = vsub.f32 %v186_v31, %v202_v1  ;;  %v239_v24 = vsub.f32 %v498_v38, %v202_v1 }
 0x315   :  { %v204_v3 = vmul.f32 1.442695, %v203_v2 }
 0x317   :  { %391 = vpow2.f32 %v204_v3 }
 0x321   :  { %v392_v4 = vpop.eup %391 }
 0x322   :  { %v217_v5 = vmul.f32 %v392_v4, %v186_v31 }
 0x324   :  { %v218_v6 = vsel %vm190_vm3, %v217_v5, 0.0 }
 0x325   :  { %219 = vadd.xlane.f32.xlu0 %v218_v6 }
 0x353   :  { %v255_v8 = vpop.xlane.xlu0 %254 }
 0x354   :  { %v260_v9 = vadd.f32 %v303_v7, %v255_v8 }
 0x356   :  { %266 = vperm.xlu0 %386, %v260_v9  }
 0x370   :  { %v234_v10 = vpop.xlane.xlu1 %233 }
 0x371   :  { %v235_v13 = vcvt.f32.s32 %v234_v10 }
 0x373   :  { %v238_v17 = vadd.s32 %v237_v14, %v235_v13 }
 0x375   :  { %v273_v21 = vcvt.s32.f32 %v238_v17 }
 0x398   :  { %v215_v12 = vpop.xlane.xlu0 %214 }
 0x399   :  { %v216_v15 = vsub.f32 %v215_v12, %v202_v1 }
 0x39b   :  { %v262_v18 = vsel %vm261_vm7, %v216_v15, 0.0 }
 0x3b2   :  { %v220_v16 = vpop.xlane.xlu0 %219 }
 0x3b3   :  { %v221_v19 = vsub.f32 %v202_v1, %v220_v16 }
 0x3d5   :  { %v267_v20 = vpop.permute.xlu0 %266 }
 0x3d6   :  { %v269_v22 = vsel %vm263_vm8, %v267_v20, %v262_v18 }
 0x3d7   :  { %v271_v23 = vsel %vm270_vm9, %v221_v19, %v269_v22 }
 0x3d8   :  { %v274_v25 = vsel %vm272_vm10, %v273_v21, %v271_v23 }
 0x3d9   :  { %v276_v26 = vsel %vm275_vm11, %v239_v24, %v274_v25 }
 0x3da   :  { %278 = vrot.lane.b32.xlu1 %v276_v26, %s420_s16 }
 0x44c   :  { %v279_v27 = vpop.permute.xlu1 %278 }
 0x44d   :  { %v281_v28 = vsel %vm190_vm3, %v392_v4, %v279_v27 }
 0x44e   :  { %283 = vst.msk [vmem:[#allocation2] sm:$0xff] %vm282_vm12, %v281_v28 }
 0x44f   :  { %404 = shalt.err (!%p401_p4)
}
 0x450   :  { %s405_s24 = scalar_lea.hbm %s535_s2, 128 }
 0x451   :  { %p406_p5 = scmp.ne.s32.totalorder %s535_s2, %s405_s24  ;;  %p409_p6 = scmp.lt.u32.totalorder %s405_s24, %s535_s2 }
 0x453   :  { %p411_p7 = pnand %p409_p6, %p406_p5 }
 0x455   :  { %414 = shalt.err (!%p411_p7)
}
 0x456   :  { %293 = dma.vmem_to_hbm [thread:$0]  %s291_s20, 128, %s535_s2, [#allocation3]  }
 0x457   :  { %415 = dma.done.wait [#allocation3], 128  }
 0x458   :  { %416 = vsyncadd [#allocation3], 4294967168 }
 0x459   :  { %297 = vsyncpa [#allocation3], 1 }

</bundles_post_ra>
